<compile_context>
chip_gen: v7x
topology: tpu7x:2x2x1
jax: 0.10.0
libtpu: 0.0.40
codegen_flags: <defaults>
</compile_context>

<pallas_src>
import functools
import math

import numpy as np

import jax
import jax.numpy as jnp
from jax.experimental import pallas as pl
from jax.experimental.pallas import tpu as pltpu

_LANE = 128

# Single-buffer constant operands when the running JAX supports pipeline_mode.
_CONST_SPEC_KW = {"pipeline_mode": pl.Buffered(1)} if hasattr(pl, "Buffered") else {}


def _round_up(v, m):
    return ((v + m - 1) // m) * m


def _cdiv(a, b):
    return -(-a // b)


def _pad2d(x, rows, cols):
    r, c = x.shape
    return jnp.pad(x, ((0, rows - r), (0, cols - c)))


def _sign(x):
    # torch.sign semantics (sign(0) == 0); explicit compare/select.
    one = jnp.ones((), x.dtype)
    return jnp.where(x > 0, one, jnp.where(x < 0, -one, jnp.zeros((), x.dtype)))


def _binarize_rows(x, c_valid):
    # sign((x - mean) / (std + 1e-4)) == sign(x - mean): (std + 1e-4) > 0 never flips
    # a sign, so the variance / sqrt / divide of the PyTorch path is dead work.
    # Padded lanes are zero, so sum over all lanes / c_valid is the exact row mean.
    mean = jnp.sum(x, axis=-1, keepdims=True) * (1.0 / c_valid)
    return _sign(x - mean)


def _sage_layer_kernel(cnt_ref, kidx_ref, a_ref, x_ref, xt_ref, invdeg_ref,
                       wl_ref, wr_ref, b_ref, o_ref, acc_ref, *,
                       tm, c_in, c_out, n_dst, binarize_input, binarize_output,
                       apply_relu, apply_log_softmax):
    i = pl.program_id(0)
    s = pl.program_id(1)

    @pl.when(s == 0)
    def _():
        acc_ref[...] = jnp.zeros_like(acc_ref)

    # Block-sparse reduction: only slots that map to a nonzero A tile accumulate;
    # slots beyond cnt[i] reuse the previous block index, so they cost no DMA.
    @pl.when(s < cnt_ref[i])
    def _():
        x = x_ref[...]
        if binarize_input:
            x = _binarize_rows(x.astype(jnp.float32), c_in)
        xs = x.astype(jnp.bfloat16)                       # bf16 MXU operands, f32 acc
        acc_ref[...] += jnp.dot(a_ref[...], xs, preferred_element_type=jnp.float32)

    @pl.when(s == pl.num_programs(1) - 1)
    def _():
        xt = xt_ref[...]
        if binarize_input:
            xt = _binarize_rows(xt.astype(jnp.float32), c_in)
        xt = xt.astype(jnp.bfloat16)
        # acc holds exact (integer, when binarized) message sums: bf16 cast is lossless
        # for deg <= 256, and 1/deg is commuted past the Wl matmul so it scales the
        # (tm, c_out) tile instead of the (tm, c_in) accumulator.
        out = (invdeg_ref[...] *
               jnp.dot(acc_ref[...].astype(jnp.bfloat16), wl_ref[...],
                       preferred_element_type=jnp.float32)
               + jnp.dot(xt, wr_ref[...], preferred_element_type=jnp.float32)
               + b_ref[...])
        if apply_relu:
            out = jnp.maximum(out, 0.0)
            # TODO(synk): F.dropout(p=0.0) is the identity in this forward pass.
        if binarize_output:
            # Fuse the NEXT layer's binarization here so it never re-binarizes the
            # same src tile once per dst tile; padded lanes forced back to zero.
            lane = jax.lax.broadcasted_iota(jnp.int32, out.shape, 1)
            out = jnp.where(lane < c_out, _binarize_rows(out, c_out), 0.0)
        if apply_log_softmax:
            lane = jax.lax.broadcasted_iota(jnp.int32, out.shape, 1)
            valid = lane < c_out
            m = jnp.max(jnp.where(valid, out, -jnp.inf), axis=-1, keepdims=True)
            e = jnp.where(valid, jnp.exp(out - m), 0.0)
            out = out - m - jnp.log(jnp.sum(e, axis=-1, keepdims=True))
        # Zero rows past n_dst so junk never leaks into the next layer's slab.
        row = i * tm + jax.lax.broadcasted_iota(jnp.int32, out.shape, 0)
        out = jnp.where(row < n_dst, out, 0.0)
        o_ref[...] = out.astype(o_ref.dtype)


def _tpu_caps():
    """Per-generation tile caps and scoped-VMEM budget."""
    kind = ""
    try:
        kind = jax.devices()[0].device_kind.lower()
    except Exception:
        pass
    if "v7" in kind:
        # 64 MiB VMEM and 2 TensorCores per chip: tighter budget, >=2 dst tiles.
        return dict(tm_cap=256, tk_cap=1024, vmem_limit=48 << 20, min_dst_tiles=2)
    if "v6" in kind or "v5" in kind:
        # 128 MiB VMEM, 1 TC: large reduction tiles to amortize per-step overhead.
        return dict(tm_cap=256, tk_cap=2048, vmem_limit=100 << 20, min_dst_tiles=1)
    return dict(tm_cap=256, tk_cap=1024, vmem_limit=64 << 20, min_dst_tiles=1)


def sage_layer(x, edge_index, n_src, n_dst, wl, wr, b, *, binarize_input,
               binarize_output, apply_relu, apply_log_softmax, caps=None):
    """One fused BiSAGEConv layer: (binarize) + mean-aggr + two linears + activation."""
    caps = caps or _tpu_caps()
    c_in, c_out = wl.shape
    c_in_pad = _round_up(c_in, _LANE)
    c_out_pad = _round_up(c_out, _LANE)

    # Balanced dst ("parallel") tiles, multiple of 16 sublanes; ensure >=2 dst tiles on
    # v7x (2 TensorCores) whenever each tile still gets at least 16 real rows.
    n_i = _cdiv(n_dst, caps["tm_cap"])
    if caps["min_dst_tiles"] > 1 and _cdiv(n_dst, 16) >= caps["min_dst_tiles"]:
        n_i = max(n_i, caps["min_dst_tiles"])
    tm = max(16, _round_up(_cdiv(n_dst, n_i), 16))
    n_dst_pad = tm * n_i

    tk = min(caps["tk_cap"], _round_up(n_src, _LANE))
    n_src_pad = _round_up(max(n_src, n_dst_pad), tk)
    n_k = n_src_pad // tk

    # Lane-dense, zero-padded feature slab; x is passed twice with two BlockSpec views
    # (src tiles / target tiles), so no host-side x_target copy is materialized.
    xp = _pad2d(x[: min(x.shape[0], n_src_pad)], n_src_pad, c_in_pad)

    # Dense 0/1 adjacency built host-side for clarity; the kernel only ever touches the
    # (i, k) tiles that contain edges (scalar-prefetched tile list below).
    # TODO(synk): at real neighbor-sampling scale, replace this dense slab with an
    # in-kernel edge-list gather (memory_space=pl.ANY + manual make_async_copy).
    src = np.asarray(jax.device_get(edge_index[0]), dtype=np.int64)
    dst = np.asarray(jax.device_get(edge_index[1]), dtype=np.int64)
    a01_np = np.zeros((n_dst_pad, n_src_pad), np.float32)
    np.add.at(a01_np, (dst, src), 1.0)
    inv_deg_np = (1.0 / np.maximum(a01_np.sum(axis=1, keepdims=True), 1.0)).astype(np.float32)

    # Per dst-tile compacted list of nonzero src-tiles (block-sparse reduction axis).
    tile_nz = np.zeros((n_i, n_k), bool)
    if src.size:
        tile_nz[dst // tm, src // tk] = True
    counts_np = tile_nz.sum(axis=1).astype(np.int32)
    k_slots = max(int(counts_np.max()), 1)
    kidx_np = np.zeros((n_i, k_slots), np.int32)
    for ii in range(n_i):
        nz = np.nonzero(tile_nz[ii])[0]
        if nz.size:
            kidx_np[ii, : nz.size] = nz
            kidx_np[ii, nz.size:] = nz[-1]     # repeat last index -> skipped slots cost no DMA

    a01 = jnp.asarray(a01_np, jnp.bfloat16)    # 0/1 (and small multi-edge counts) exact in bf16
    inv_deg = jnp.asarray(inv_deg_np)
    counts = jnp.asarray(counts_np)
    kidx = jnp.asarray(kidx_np)

    wl_p = _pad2d(wl, c_in_pad, c_out_pad).astype(jnp.bfloat16)
    wr_p = _pad2d(wr, c_in_pad, c_out_pad).astype(jnp.bfloat16)
    b_p = _pad2d(b.reshape(1, -1), 1, c_out_pad).astype(jnp.float32)

    out_dtype = jnp.float32 if apply_log_softmax else jnp.bfloat16

    kernel = functools.partial(
        _sage_layer_kernel, tm=tm, c_in=c_in, c_out=c_out, n_dst=n_dst,
        binarize_input=binarize_input, binarize_output=binarize_output,
        apply_relu=apply_relu, apply_log_softmax=apply_log_softmax)

    grid = (n_i, k_slots)
    return pl.pallas_call(
        kernel,
        out_shape=jax.ShapeDtypeStruct((n_dst_pad, c_out_pad), out_dtype),
        grid_spec=pltpu.PrefetchScalarGridSpec(
            num_scalar_prefetch=2,
            grid=grid,
            in_specs=[
                # A tile: data-dependent src-tile index from the prefetched table.
                pl.BlockSpec((tm, tk), lambda i, s, cnt, kid: (i, kid[i, s])),
                # x: src rows (same data-dependent src-tile index).
                pl.BlockSpec((tk, c_in_pad), lambda i, s, cnt, kid: (kid[i, s], 0)),
                # x: target rows.
                pl.BlockSpec((tm, c_in_pad), lambda i, s, cnt, kid: (i, 0)),
                # 1/deg.
                pl.BlockSpec((tm, 1), lambda i, s, cnt, kid: (i, 0)),
                # Wl / Wr: constant across the grid -> single-buffered.
                pl.BlockSpec((c_in_pad, c_out_pad), lambda i, s, cnt, kid: (0, 0),
                             **_CONST_SPEC_KW),
                pl.BlockSpec((c_in_pad, c_out_pad), lambda i, s, cnt, kid: (0, 0),
                             **_CONST_SPEC_KW),
                # bias.
                pl.BlockSpec((1, c_out_pad), lambda i, s, cnt, kid: (0, 0)),
            ],
            out_specs=pl.BlockSpec((tm, c_out_pad), lambda i, s, cnt, kid: (i, 0)),
            scratch_shapes=[pltpu.VMEM((tm, c_in_pad), jnp.float32)],
        ),
        compiler_params=pltpu.CompilerParams(
            dimension_semantics=("parallel", "arbitrary"),
            vmem_limit_bytes=caps["vmem_limit"]),
    )(counts, kidx, a01, xp, xp, inv_deg, wl_p, wr_p, b_p)


def neighbor_sampling_gcn_forward(x, adjs, params, *, binarize):
    """adjs: list of (edge_index [2,E], size=(n_src, n_dst)); params: list of (Wl, Wr, b)."""
    caps = _tpu_caps()
    num_layers = len(adjs)
    pre_binarized = False
    n_dst_last = c_out_last = None
    for i, (edge_index, size) in enumerate(adjs):
        n_src, n_dst = size
        wl, wr, b = params[i]
        last = i == num_layers - 1
        x = sage_layer(
            x, edge_index, n_src, n_dst, wl, wr, b,
            # Input binarization only when the slab was not pre-binarized upstream.
            binarize_input=binarize and not pre_binarized,
            # Fuse the next layer's binarization into this layer's epilogue.
            binarize_output=binarize and not last,
            apply_relu=not last, apply_log_softmax=last, caps=caps)
        pre_binarized = binarize and not last
        n_dst_last, c_out_last = n_dst, wl.shape[1]
    # Crop lane/row padding once, after the final log_softmax.
    return x[:n_dst_last, :c_out_last]


def init_params(key, in_channels, hidden_channels, out_channels):
    ks = jax.random.split(key, 4)

    def glorot(k, fan_in, fan_out):
        lim = (6.0 / (fan_in + fan_out)) ** 0.5
        return jax.random.uniform(k, (fan_in, fan_out), jnp.float32, -lim, lim)

    params = [
        (glorot(ks[0], in_channels, hidden_channels),
         glorot(ks[1], in_channels, hidden_channels),
         jnp.zeros((1, hidden_channels), jnp.float32)),
        (glorot(ks[2], hidden_channels, out_channels),
         glorot(ks[3], hidden_channels, out_channels),
         jnp.zeros((1, out_channels), jnp.float32)),
    ]
    return params


if __name__ == "__main__":
    key = jax.random.PRNGKey(0)
    k_x, k_e1, k_e2, k_p = jax.random.split(key, 4)

    in_channels, hidden_channels, out_channels = 16, 32, 8
    n_src1, n_dst1 = 32, 16          # hop 1: 32 sampled nodes -> 16 targets
    n_src2, n_dst2 = n_dst1, 8       # hop 2: 16 nodes -> 8 root targets
    e1, e2 = 64, 32

    x = jax.random.normal(k_x, (n_src1, in_channels), jnp.float32)

    edge_index1 = jnp.stack([
        jax.random.randint(k_e1, (e1,), 0, n_src1),
        jax.random.randint(jax.random.fold_in(k_e1, 1), (e1,), 0, n_dst1),
    ]).astype(jnp.int32)
    edge_index2 = jnp.stack([
        jax.random.randint(k_e2, (e2,), 0, n_src2),
        jax.random.randint(jax.random.fold_in(k_e2, 1), (e2,), 0, n_dst2),
    ]).astype(jnp.int32)

    adjs = [(edge_index1, (n_src1, n_dst1)), (edge_index2, (n_src2, n_dst2))]
    params = init_params(k_p, in_channels, hidden_channels, out_channels)

    out_bin = neighbor_sampling_gcn_forward(x, adjs, params, binarize=True)
    out_bin = jax.block_until_ready(out_bin)
    assert out_bin.shape == (n_dst2, out_channels)

    out_fp = neighbor_sampling_gcn_forward(x, adjs, params, binarize=False)
    out_fp = jax.block_until_ready(out_fp)
    assert out_fp.shape == (n_dst2, out_channels)

    print("KERNEL_OK")
</pallas_src>

<mosaic_0001>
module attributes {stable_mosaic.version = 11 : i64} {
  func.func @_sage_layer_kernel(%arg0: i32, %arg1: i32, %arg2: memref<1xi32, #tpu.memory_space<smem>>, %arg3: memref<1x1xi32, #tpu.memory_space<smem>>, %arg4: memref<16x128xbf16, #tpu.memory_space<vmem>>, %arg5: memref<128x128xf32, #tpu.memory_space<vmem>>, %arg6: memref<16x128xf32, #tpu.memory_space<vmem>>, %arg7: memref<16x1xf32, #tpu.memory_space<vmem>>, %arg8: memref<128x128xbf16, #tpu.memory_space<vmem>>, %arg9: memref<128x128xbf16, #tpu.memory_space<vmem>>, %arg10: memref<1x128xf32, #tpu.memory_space<vmem>>, %arg11: memref<16x128xbf16, #tpu.memory_space<vmem>>, %arg12: memref<16x128xf32, #tpu.memory_space<vmem>>) attributes {dimension_semantics = [#tpu.dimension_semantics<parallel>, #tpu.dimension_semantics<arbitrary>], iteration_bounds = array<i64: 1, 1>, scalar_prefetch = 2 : i64, scratch_operands = 1 : i64, tpu.core_type = #tpu.core_type<tc>, window_params = [{transform_indices = @transform_0, window_bounds = array<i64: 16, 128>}, {transform_indices = @transform_1, window_bounds = array<i64: 128, 128>}, {transform_indices = @transform_2, window_bounds = array<i64: 16, 128>}, {transform_indices = @transform_3, window_bounds = array<i64: 16, 1>}, {pipeline_mode = #tpu.pipeline_mode<synchronous>, transform_indices = @transform_4, window_bounds = array<i64: 128, 128>}, {pipeline_mode = #tpu.pipeline_mode<synchronous>, transform_indices = @transform_5, window_bounds = array<i64: 128, 128>}, {pipeline_mode = #tpu.pipeline_mode<synchronous>, transform_indices = @transform_6, window_bounds = array<i64: 1, 128>}, {transform_indices = @transform_7, window_bounds = array<i64: 16, 128>}]} {
    %c0_i32 = arith.constant 0 : i32
    %0 = arith.cmpi eq, %arg1, %c0_i32 : i32
    %1 = arith.extui %0 : i1 to i32
    %c0_i32_0 = arith.constant 0 : i32
    %2 = arith.cmpi ne, %1, %c0_i32_0 : i32
    scf.if %2 {
      %cst = arith.constant 0.000000e+00 : f32
      %11 = vector.broadcast %cst : f32 to vector<16x128xf32>
      %c0 = arith.constant 0 : index
      %c0_4 = arith.constant 0 : index
      %12 = vector.load %arg12[%c0, %c0_4] : memref<16x128xf32, #tpu.memory_space<vmem>>, vector<16x128xf32>
      tpu.vector_store %arg12[%c0, %c0_4], %11 {strides = array<i32>} : memref<16x128xf32, #tpu.memory_space<vmem>>, vector<16x128xf32>,
    } else {
    }
    %3 = arith.index_cast %arg0 : i32 to index
    %4 = memref.load %arg2[%3] : memref<1xi32, #tpu.memory_space<smem>>
    %5 = arith.cmpi slt, %arg1, %4 : i32
    %6 = arith.extui %5 : i1 to i32
    %c0_i32_1 = arith.constant 0 : i32
    %7 = arith.cmpi ne, %6, %c0_i32_1 : i32
    scf.if %7 {
      %c0 = arith.constant 0 : index
      %c0_4 = arith.constant 0 : index
      %11 = vector.load %arg5[%c0, %c0_4] : memref<128x128xf32, #tpu.memory_space<vmem>>, vector<128x128xf32>
      %cst = arith.constant dense<0.000000e+00> : vector<128xf32>
      %12 = vector.multi_reduction <add>, %11, %cst [1] : vector<128x128xf32> to vector<128xf32>
      %13 = vector.shape_cast %12 : vector<128xf32> to vector<128x1xf32>
      %cst_5 = arith.constant 6.250000e-02 : f32
      %14 = vector.broadcast %cst_5 : f32 to vector<128x1xf32>
      %15 = arith.mulf %13, %14 : vector<128x1xf32>
      %16 = vector.broadcast %15 : vector<128x1xf32> to vector<128x128xf32>
      %17 = arith.subf %11, %16 : vector<128x128xf32>
      %cst_6 = arith.constant 0.000000e+00 : f32
      %18 = vector.broadcast %cst_6 : f32 to vector<128x128xf32>
      %19 = arith.cmpf ogt, %17, %18 : vector<128x128xf32>
      %cst_7 = arith.constant 0.000000e+00 : f32
      %20 = vector.broadcast %cst_7 : f32 to vector<128x128xf32>
      %21 = arith.cmpf olt, %17, %20 : vector<128x128xf32>
      %cst_8 = arith.constant 0.000000e+00 : f32
      %cst_9 = arith.constant 1.000000e+00 : f32
      %22 = arith.subf %cst_8, %cst_9 : f32
      %cst_10 = arith.constant 0.000000e+00 : f32
      %23 = vector.broadcast %22 : f32 to vector<128x128xf32>
      %24 = vector.broadcast %cst_10 : f32 to vector<128x128xf32>
      %25 = arith.select %21, %23, %24 : vector<128x128xi1>, vector<128x128xf32>
      %cst_11 = arith.constant 1.000000e+00 : f32
      %26 = vector.broadcast %cst_11 : f32 to vector<128x128xf32>
      %27 = arith.select %19, %26, %25 : vector<128x128xi1>, vector<128x128xf32>
      %28 = arith.truncf %27 : vector<128x128xf32> to vector<128x128xbf16>
      %c0_12 = arith.constant 0 : index
      %c0_13 = arith.constant 0 : index
      %29 = vector.load %arg12[%c0_12, %c0_13] : memref<16x128xf32, #tpu.memory_space<vmem>>, vector<16x128xf32>
      %c0_14 = arith.constant 0 : index
      %c0_15 = arith.constant 0 : index
      %30 = vector.load %arg4[%c0_14, %c0_15] : memref<16x128xbf16, #tpu.memory_space<vmem>>, vector<16x128xbf16>
      %cst_16 = arith.constant dense<0.000000e+00> : vector<16x128xf32>
      %31 = tpu.matmul %30, %28, %cst_16 {dimension_numbers = #tpu.dot_dimension_numbers<[1], [0], [0], [1], [0, 0, 1, 1], [], []>} : vector<16x128xbf16>, vector<128x128xbf16>, vector<16x128xf32> -> vector<16x128xf32>
      %32 = arith.addf %29, %31 : vector<16x128xf32>
      %c0_17 = arith.constant 0 : index
      %c0_18 = arith.constant 0 : index
      %33 = vector.load %arg12[%c0_17, %c0_18] : memref<16x128xf32, #tpu.memory_space<vmem>>, vector<16x128xf32>
      tpu.vector_store %arg12[%c0_17, %c0_18], %32 {strides = array<i32>} : memref<16x128xf32, #tpu.memory_space<vmem>>, vector<16x128xf32>,
    } else {
    }
    %c0_i32_2 = arith.constant 0 : i32
    %8 = arith.cmpi eq, %arg1, %c0_i32_2 : i32
    %9 = arith.extui %8 : i1 to i32
    %c0_i32_3 = arith.constant 0 : i32
    %10 = arith.cmpi ne, %9, %c0_i32_3 : i32
    scf.if %10 {
      %c0 = arith.constant 0 : index
      %c0_4 = arith.constant 0 : index
      %11 = vector.load %arg6[%c0, %c0_4] : memref<16x128xf32, #tpu.memory_space<vmem>>, vector<16x128xf32>
      %cst = arith.constant dense<0.000000e+00> : vector<16xf32>
      %12 = vector.multi_reduction <add>, %11, %cst [1] : vector<16x128xf32> to vector<16xf32>
      %13 = vector.shape_cast %12 : vector<16xf32> to vector<16x1xf32>
      %cst_5 = arith.constant 6.250000e-02 : f32
      %14 = vector.broadcast %cst_5 : f32 to vector<16x1xf32>
      %15 = arith.mulf %13, %14 : vector<16x1xf32>
      %16 = vector.broadcast %15 : vector<16x1xf32> to vector<16x128xf32>
      %17 = arith.subf %11, %16 : vector<16x128xf32>
      %cst_6 = arith.constant 0.000000e+00 : f32
      %18 = vector.broadcast %cst_6 : f32 to vector<16x128xf32>
      %19 = arith.cmpf ogt, %17, %18 : vector<16x128xf32>
      %cst_7 = arith.constant 0.000000e+00 : f32
      %20 = vector.broadcast %cst_7 : f32 to vector<16x128xf32>
      %21 = arith.cmpf olt, %17, %20 : vector<16x128xf32>
      %cst_8 = arith.constant 0.000000e+00 : f32
      %cst_9 = arith.constant 1.000000e+00 : f32
      %22 = arith.subf %cst_8, %cst_9 : f32
      %cst_10 = arith.constant 0.000000e+00 : f32
      %23 = vector.broadcast %22 : f32 to vector<16x128xf32>
      %24 = vector.broadcast %cst_10 : f32 to vector<16x128xf32>
      %25 = arith.select %21, %23, %24 : vector<16x128xi1>, vector<16x128xf32>
      %cst_11 = arith.constant 1.000000e+00 : f32
      %26 = vector.broadcast %cst_11 : f32 to vector<16x128xf32>
      %27 = arith.select %19, %26, %25 : vector<16x128xi1>, vector<16x128xf32>
      %28 = arith.truncf %27 : vector<16x128xf32> to vector<16x128xbf16>
      %c0_12 = arith.constant 0 : index
      %c0_13 = arith.constant 0 : index
      %29 = vector.load %arg7[%c0_12, %c0_13] : memref<16x1xf32, #tpu.memory_space<vmem>>, vector<16x1xf32>
      %c0_14 = arith.constant 0 : index
      %c0_15 = arith.constant 0 : index
      %30 = vector.load %arg12[%c0_14, %c0_15] : memref<16x128xf32, #tpu.memory_space<vmem>>, vector<16x128xf32>
      %31 = arith.truncf %30 : vector<16x128xf32> to vector<16x128xbf16>
      %c0_16 = arith.constant 0 : index
      %c0_17 = arith.constant 0 : index
      %32 = vector.load %arg8[%c0_16, %c0_17] : memref<128x128xbf16, #tpu.memory_space<vmem>>, vector<128x128xbf16>
      %cst_18 = arith.constant dense<0.000000e+00> : vector<16x128xf32>
      %33 = tpu.matmul %31, %32, %cst_18 {dimension_numbers = #tpu.dot_dimension_numbers<[1], [0], [0], [1], [0, 0, 1, 1], [], []>} : vector<16x128xbf16>, vector<128x128xbf16>, vector<16x128xf32> -> vector<16x128xf32>
      %34 = vector.broadcast %29 : vector<16x1xf32> to vector<16x128xf32>
      %35 = arith.mulf %34, %33 : vector<16x128xf32>
      %c0_19 = arith.constant 0 : index
      %c0_20 = arith.constant 0 : index
      %36 = vector.load %arg9[%c0_19, %c0_20] : memref<128x128xbf16, #tpu.memory_space<vmem>>, vector<128x128xbf16>
      %cst_21 = arith.constant dense<0.000000e+00> : vector<16x128xf32>
      %37 = tpu.matmul %28, %36, %cst_21 {dimension_numbers = #tpu.dot_dimension_numbers<[1], [0], [0], [1], [0, 0, 1, 1], [], []>} : vector<16x128xbf16>, vector<128x128xbf16>, vector<16x128xf32> -> vector<16x128xf32>
      %38 = arith.addf %35, %37 : vector<16x128xf32>
      %c0_22 = arith.constant 0 : index
      %c0_23 = arith.constant 0 : index
      %39 = vector.load %arg10[%c0_22, %c0_23] : memref<1x128xf32, #tpu.memory_space<vmem>>, vector<1x128xf32>
      %40 = vector.broadcast %39 : vector<1x128xf32> to vector<16x128xf32>
      %41 = arith.addf %38, %40 : vector<16x128xf32>
      %cst_24 = arith.constant 0.000000e+00 : f32
      %42 = vector.broadcast %cst_24 : f32 to vector<16x128xf32>
      %43 = arith.maximumf %41, %42 : vector<16x128xf32>
      %44 = tpu.iota {dimensions = array<i32: 1>} : vector<16x128xi32>
      %c32_i32 = arith.constant 32 : i32
      %45 = vector.broadcast %c32_i32 : i32 to vector<16x128xi32>
      %46 = arith.cmpi slt, %44, %45 : vector<16x128xi32>
      %cst_25 = arith.constant dense<0.000000e+00> : vector<16xf32>
      %47 = vector.multi_reduction <add>, %43, %cst_25 [1] : vector<16x128xf32> to vector<16xf32>
      %48 = vector.shape_cast %47 : vector<16xf32> to vector<16x1xf32>
      %cst_26 = arith.constant 3.125000e-02 : f32
      %49 = vector.broadcast %cst_26 : f32 to vector<16x1xf32>
      %50 = arith.mulf %48, %49 : vector<16x1xf32>
      %51 = vector.broadcast %50 : vector<16x1xf32> to vector<16x128xf32>
      %52 = arith.subf %43, %51 : vector<16x128xf32>
      %cst_27 = arith.constant 0.000000e+00 : f32
      %53 = vector.broadcast %cst_27 : f32 to vector<16x128xf32>
      %54 = arith.cmpf ogt, %52, %53 : vector<16x128xf32>
      %cst_28 = arith.constant 0.000000e+00 : f32
      %55 = vector.broadcast %cst_28 : f32 to vector<16x128xf32>
      %56 = arith.cmpf olt, %52, %55 : vector<16x128xf32>
      %cst_29 = arith.constant 0.000000e+00 : f32
      %cst_30 = arith.constant 1.000000e+00 : f32
      %57 = arith.subf %cst_29, %cst_30 : f32
      %cst_31 = arith.constant 0.000000e+00 : f32
      %58 = vector.broadcast %57 : f32 to vector<16x128xf32>
      %59 = vector.broadcast %cst_31 : f32 to vector<16x128xf32>
      %60 = arith.select %56, %58, %59 : vector<16x128xi1>, vector<16x128xf32>
      %cst_32 = arith.constant 1.000000e+00 : f32
      %61 = vector.broadcast %cst_32 : f32 to vector<16x128xf32>
      %62 = arith.select %54, %61, %60 : vector<16x128xi1>, vector<16x128xf32>
      %cst_33 = arith.constant 0.000000e+00 : f32
      %63 = vector.broadcast %cst_33 : f32 to vector<16x128xf32>
      %64 = arith.select %46, %62, %63 : vector<16x128xi1>, vector<16x128xf32>
      %c16_i32 = arith.constant 16 : i32
      %65 = arith.muli %arg0, %c16_i32 : i32
      %66 = tpu.iota {dimensions = array<i32: 0>} : vector<16x128xi32>
      %67 = vector.broadcast %65 : i32 to vector<16x128xi32>
      %68 = arith.addi %67, %66 : vector<16x128xi32>
      %c16_i32_34 = arith.constant 16 : i32
      %69 = vector.broadcast %c16_i32_34 : i32 to vector<16x128xi32>
      %70 = arith.cmpi slt, %68, %69 : vector<16x128xi32>
      %cst_35 = arith.constant 0.000000e+00 : f32
      %71 = vector.broadcast %cst_35 : f32 to vector<16x128xf32>
      %72 = arith.select %70, %64, %71 : vector<16x128xi1>, vector<16x128xf32>
      %73 = arith.truncf %72 : vector<16x128xf32> to vector<16x128xbf16>
      %c0_36 = arith.constant 0 : index
      %c0_37 = arith.constant 0 : index
      %74 = vector.load %arg11[%c0_36, %c0_37] : memref<16x128xbf16, #tpu.memory_space<vmem>>, vector<16x128xbf16>
      tpu.vector_store %arg11[%c0_36, %c0_37], %73 {strides = array<i32>} : memref<16x128xbf16, #tpu.memory_space<vmem>>, vector<16x128xbf16>,
    } else {
    }
    return
  }
  func.func @transform_0(%arg0: i32, %arg1: i32, %arg2: memref<1xi32, #tpu.memory_space<smem>>, %arg3: memref<1x1xi32, #tpu.memory_space<smem>>) -> (i32, i32) {
    %0 = arith.index_cast %arg0 : i32 to index
    %1 = arith.index_cast %arg1 : i32 to index
    %2 = memref.load %arg3[%0, %1] : memref<1x1xi32, #tpu.memory_space<smem>>
    %c0_i32 = arith.constant 0 : i32
    return %arg0, %2 : i32, i32
  }
  func.func @transform_1(%arg0: i32, %arg1: i32, %arg2: memref<1xi32, #tpu.memory_space<smem>>, %arg3: memref<1x1xi32, #tpu.memory_space<smem>>) -> (i32, i32) {
    %0 = arith.index_cast %arg0 : i32 to index
    %1 = arith.index_cast %arg1 : i32 to index
    %2 = memref.load %arg3[%0, %1] : memref<1x1xi32, #tpu.memory_space<smem>>
    %c0_i32 = arith.constant 0 : i32
    %c0_i32_0 = arith.constant 0 : i32
    return %2, %c0_i32 : i32, i32
  }
  func.func @transform_2(%arg0: i32, %arg1: i32, %arg2: memref<1xi32, #tpu.memory_space<smem>>, %arg3: memref<1x1xi32, #tpu.memory_space<smem>>) -> (i32, i32) {
    %c0_i32 = arith.constant 0 : i32
    %c0_i32_0 = arith.constant 0 : i32
    return %arg0, %c0_i32 : i32, i32
  }
  func.func @transform_3(%arg0: i32, %arg1: i32, %arg2: memref<1xi32, #tpu.memory_space<smem>>, %arg3: memref<1x1xi32, #tpu.memory_space<smem>>) -> (i32, i32) {
    %c0_i32 = arith.constant 0 : i32
    %c0_i32_0 = arith.constant 0 : i32
    return %arg0, %c0_i32 : i32, i32
  }
  func.func @transform_4(%arg0: i32, %arg1: i32, %arg2: memref<1xi32, #tpu.memory_space<smem>>, %arg3: memref<1x1xi32, #tpu.memory_space<smem>>) -> (i32, i32) {
    %c0_i32 = arith.constant 0 : i32
    %c0_i32_0 = arith.constant 0 : i32
    %c0_i32_1 = arith.constant 0 : i32
    return %c0_i32, %c0_i32_0 : i32, i32
  }
  func.func @transform_5(%arg0: i32, %arg1: i32, %arg2: memref<1xi32, #tpu.memory_space<smem>>, %arg3: memref<1x1xi32, #tpu.memory_space<smem>>) -> (i32, i32) {
    %c0_i32 = arith.constant 0 : i32
    %c0_i32_0 = arith.constant 0 : i32
    %c0_i32_1 = arith.constant 0 : i32
    return %c0_i32, %c0_i32_0 : i32, i32
  }
  func.func @transform_6(%arg0: i32, %arg1: i32, %arg2: memref<1xi32, #tpu.memory_space<smem>>, %arg3: memref<1x1xi32, #tpu.memory_space<smem>>) -> (i32, i32) {
    %c0_i32 = arith.constant 0 : i32
    %c0_i32_0 = arith.constant 0 : i32
    %c0_i32_1 = arith.constant 0 : i32
    return %c0_i32, %c0_i32_0 : i32, i32
  }
  func.func @transform_7(%arg0: i32, %arg1: i32, %arg2: memref<1xi32, #tpu.memory_space<smem>>, %arg3: memref<1x1xi32, #tpu.memory_space<smem>>) -> (i32, i32) {
    %c0_i32 = arith.constant 0 : i32
    %c0_i32_0 = arith.constant 0 : i32
    return %arg0, %c0_i32 : i32, i32
  }
}

</mosaic_0001>

<bundles_post_ra>
// kernel: tpu_custom_call.1
= control target key start
LH: loop header
LB: loop body
LE: loop exit
PB: predicated region body
PF: predicated region fallthrough
CT: control target
= control target key end

     0   :  { %16 = vsyncpa [#allocation7], 0  ;;  %s1338_s0 = inlined_call_operand.<no memory space> [shape: s32[1], index: 0, kind: input, shape index: {}]   ;;  %s1339_s1 = inlined_call_operand.<no memory space> [shape: s32[1,1], index: 1, kind: input, shape index: {}]   ;;  %s1340_s2 = inlined_call_operand.hbm [shape: bf16[16,128], index: 2, kind: input, shape index: {}]   ;;  %s1341_s3 = inlined_call_operand.hbm [shape: f32[128,128], index: 3, kind: input, shape index: {}]   ;;  %s1342_s4 = inlined_call_operand.hbm [shape: f32[128,128], index: 4, kind: input, shape index: {}]   ;;  %s1343_s5 = inlined_call_operand.hbm [shape: f32[16,1], index: 5, kind: input, shape index: {}]   ;;  %s1344_s6 = inlined_call_operand.hbm [shape: bf16[128,128], index: 6, kind: input, shape index: {}]   ;;  %s1345_s7 = inlined_call_operand.hbm [shape: bf16[128,128], index: 7, kind: input, shape index: {}]   ;;  %s1346_s8 = inlined_call_operand.hbm [shape: f32[1,128], index: 8, kind: input, shape index: {}]   ;;  %s1347_s9 = inlined_call_operand.hbm [shape: bf16[16,128], index: 9, kind: output, shape index: {}]  }
   0x1   :  { %17 = vsyncpa [#allocation10], 0 }
   0x2   :  { %18 = vsyncpa [#allocation13], 0 }
   0x3   :  { %19 = vsyncpa [#allocation16], 0  ;;  %s718_s11 = sshll.u32 %s1339_s1, 11 }
   0x4   :  { %20 = vsyncpa [#allocation8], 0  ;;  %s50_s14 = scalar_lea.hbm %s1341_s3, %s718_s11  ;;  %s1037_s15 = smov [#allocation9]  }
   0x5   :  { %s51_s16 = sshll.u32 %s1037_s15, 4  ;;  %s847_s17 = scalar_lea.hbm %s50_s14, 2048  ;;  %s52_s16 = int_to_ptr.vmem [resolvable:$true] %s51_s16 }
   0x6   :  { %p848_p0 = scmp.ne.s32.totalorder %s50_s14, %s847_s17  ;;  %s849_s20 = scalar_lea.hbm %s1341_s3, 2048 }
   0x7   :  { %p850_p1 = scmp.lt.u32.totalorder %s50_s14, %s1341_s3  ;;  %p851_p2 = scmp.lt.u32.totalorder %s849_s20, %s847_s17 }
   0x8   :  { %p853_p4 = scmp.lt.u32.totalorder %s847_s17, %s50_s14 }
   0x9   :  { %p852_p3 = por %p851_p2, %p850_p1 }
   0xb   :  { %p854_p5 = por %p853_p4, %p852_p3 }
   0xd   :  { %p855_p6 = pnand %p854_p5, %p848_p0 }
   0xf   :  { %858 = shalt.err (!%p855_p6)
}
  0x10   :  { %s859_s23 = scalar_lea.vmem %s52_s16, 2048  ;;  %p864_p8 = scmp.lt.s32.totalorder %s52_s16, %s52_s16 }
  0x11   :  { %p860_p7 = scmp.ne.s32.totalorder %s52_s16, %s859_s23  ;;  %p865_p9 = scmp.lt.s32.totalorder %s859_s23, %s859_s23 }
  0x13   :  { %p866_p10 = por %p865_p9, %p864_p8 }
  0x15   :  { %p867_p11 = pnand %p866_p10, %p860_p7 }
  0x17   :  { %870 = shalt.err (!%p867_p11)
}
  0x18   :  { %s1038_s24 = smov 128   ;;  %s1039_s25 = smov 8  }
  0x19   :  { %57 = dma.hbm_to_vmem [thread:$0]  %s50_s14, 2048, %s52_s16, [#allocation10], %s1038_s24, %s1038_s24, %s1039_s25  }
  0x1a   :  { %s1040_s3 = smov [#allocation12]   ;;  %s871_s29 = scalar_lea.hbm %s1343_s5, 256 }
  0x1b   :  { %s75_s26 = sshll.u32 %s1040_s3, 4  ;;  %p872_p12 = scmp.ne.s32.totalorder %s1343_s5, %s871_s29  ;;  %s76_s26 = int_to_ptr.vmem [resolvable:$true] %s75_s26 }
  0x1c   :  { %p875_p13 = scmp.lt.u32.totalorder %s871_s29, %s1343_s5 }
  0x1e   :  { %p877_p0 = pnand %p875_p13, %p872_p12 }
  0x20   :  { %880 = shalt.err (!%p877_p0)
}
  0x21   :  { %s881_s13 = scalar_lea.vmem %s76_s26, 256  ;;  %p886_p2 = scmp.lt.s32.totalorder %s76_s26, %s76_s26 }
  0x22   :  { %p882_p1 = scmp.ne.s32.totalorder %s76_s26, %s881_s13  ;;  %p887_p3 = scmp.lt.s32.totalorder %s881_s13, %s881_s13 }
  0x24   :  { %p888_p4 = por %p887_p3, %p886_p2 }
  0x26   :  { %p889_p5 = pnand %p888_p4, %p882_p1 }
  0x28   :  { %892 = shalt.err (!%p889_p5)
}
  0x29   :  { %81 = dma.hbm_to_vmem [thread:$0]  %s1343_s5, 256, %s76_s26, [#allocation13], %s1038_s24, %s1038_s24, %s1039_s25  }
  0x2a   :  { %s693_s18 = sshll.u32 %s1339_s1, 6  ;;  %s1041_s19 = smov [#allocation15]  }
  0x2b   :  { %s99_s20 = sshll.u32 %s1041_s19, 4  ;;  %s1140_s23 = scalar_lea.hbm %s1340_s2, %s693_s18  ;;  %s100_s20 = int_to_ptr.vmem [resolvable:$true] %s99_s20 }
  0x2c   :  { %s893_s28 = scalar_lea.hbm %s1345_s7, 1024 }
  0x2d   :  { %p894_p6 = scmp.ne.s32.totalorder %s1345_s7, %s893_s28  ;;  %p897_p7 = scmp.lt.u32.totalorder %s893_s28, %s1345_s7 }
  0x2f   :  { %p899_p8 = pnand %p897_p7, %p894_p6 }
  0x31   :  { %902 = shalt.err (!%p899_p8)
}
  0x32   :  { %s903_s1 = scalar_lea.vmem %s100_s20, 1024  ;;  %p908_p10 = scmp.lt.s32.totalorder %s100_s20, %s100_s20 }
  0x33   :  { %p904_p9 = scmp.ne.s32.totalorder %s100_s20, %s903_s1  ;;  %p909_p11 = scmp.lt.s32.totalorder %s903_s1, %s903_s1 }
  0x35   :  { %p910_p12 = por %p909_p11, %p908_p10 }
  0x37   :  { %p911_p13 = pnand %p910_p12, %p904_p9 }
  0x39   :  { %914 = shalt.err (!%p911_p13)
}
  0x3a   :  { %s1042_s10 = smov 64   ;;  %s1043_s11 = smov 4  }
  0x3b   :  { %105 = dma.hbm_to_vmem [thread:$0]  %s1345_s7, 1024, %s100_s20, [#allocation16], %s1042_s10, %s1042_s10, %s1043_s11  }
  0x3c   :  { %s1044_s14 = smov [#allocation6]   ;;  %s1045_s16 = smov [#allocation11]  }
  0x3d   :  { %s32_s15 = sshll.u32 %s1044_s14, 4  ;;  %s63_s17 = sshll.u32 %s1045_s16, 4  ;;  %s33_s15 = int_to_ptr.vmem [resolvable:$true] %s32_s15  ;;  %s64_s17 = int_to_ptr.vmem [resolvable:$true] %s63_s17 }
  0x3e   :  { %s915_s18 = scalar_lea.hbm %s1140_s23, 128  ;;  %s917_s22 = scalar_lea.hbm %s1340_s2, 128 }
  0x3f   :  { %p916_p0 = scmp.ne.s32.totalorder %s1140_s23, %s915_s18  ;;  %p918_p1 = scmp.lt.u32.totalorder %s1140_s23, %s1340_s2 }
  0x40   :  { %p919_p2 = scmp.lt.u32.totalorder %s917_s22, %s915_s18  ;;  %p921_p4 = scmp.lt.u32.totalorder %s915_s18, %s1140_s23 }
  0x42   :  { %p920_p3 = por %p919_p2, %p918_p1 }
  0x44   :  { %p922_p5 = por %p921_p4, %p920_p3 }
  0x46   :  { %p923_p6 = pnand %p922_p5, %p916_p0 }
  0x48   :  { %926 = shalt.err (!%p923_p6)
}
  0x49   :  { %s927_s7 = scalar_lea.vmem %s33_s15, 128  ;;  %p932_p8 = scmp.lt.s32.totalorder %s33_s15, %s33_s15 }
  0x4a   :  { %p928_p7 = scmp.ne.s32.totalorder %s33_s15, %s927_s7  ;;  %p933_p9 = scmp.lt.s32.totalorder %s927_s7, %s927_s7 }
  0x4c   :  { %p934_p10 = por %p933_p9, %p932_p8 }
  0x4e   :  { %p935_p11 = pnand %p934_p10, %p928_p7 }
  0x50   :  { %938 = shalt.err (!%p935_p11)
}
  0x51   :  { %38 = dma.hbm_to_vmem [thread:$0]  %s1140_s23, 128, %s33_s15, [#allocation7], %s1042_s10, %s1042_s10, %s1043_s11  }
  0x52   :  { %s939_s28 = scalar_lea.hbm %s1342_s4, 256  ;;  %s941_s1 = scalar_lea.hbm %s1342_s4, 2048 }
  0x53   :  { %p940_p12 = scmp.ne.s32.totalorder %s1342_s4, %s939_s28  ;;  %p942_p13 = scmp.lt.u32.totalorder %s941_s1, %s939_s28 }
  0x54   :  { %p943_p0 = scmp.lt.u32.totalorder %s939_s28, %s1342_s4 }
  0x56   :  { %p944_p1 = por %p943_p0, %p942_p13 }
  0x58   :  { %p945_p2 = pnand %p944_p1, %p940_p12 }
  0x5a   :  { %948 = shalt.err (!%p945_p2)
}
  0x5b   :  { %s949_s23 = scalar_lea.vmem %s64_s17, 256  ;;  %p954_p4 = scmp.lt.s32.totalorder %s64_s17, %s64_s17 }
  0x5c   :  { %p950_p3 = scmp.ne.s32.totalorder %s64_s17, %s949_s23  ;;  %p955_p5 = scmp.lt.s32.totalorder %s949_s23, %s949_s23 }
  0x5e   :  { %p956_p6 = por %p955_p5, %p954_p4 }
  0x60   :  { %p957_p7 = pnand %p956_p6, %p950_p3 }
  0x62   :  { %960 = shalt.err (!%p957_p7)
}
  0x63   :  { %69 = dma.hbm_to_vmem [thread:$0]  %s1342_s4, 256, %s64_s17, [#allocation10], %s1038_s24, %s1038_s24, %s1039_s25  }
  0x64   :  { %s1046_s16 = smov [#allocation14]   ;;  %s1047_s19 = smov [#allocation17]  }
  0x65   :  { %s87_s18 = sshll.u32 %s1046_s16, 4  ;;  %s112_s21 = sshll.u32 %s1047_s19, 4  ;;  %s88_s18 = int_to_ptr.vmem [resolvable:$true] %s87_s18  ;;  %s113_s21 = int_to_ptr.vmem [resolvable:$true] %s112_s21 }
  0x66   :  { %s961_s27 = scalar_lea.hbm %s1344_s6, 1024 }
  0x67   :  { %p962_p8 = scmp.ne.s32.totalorder %s1344_s6, %s961_s27  ;;  %p965_p9 = scmp.lt.u32.totalorder %s961_s27, %s1344_s6 }
  0x69   :  { %p967_p10 = pnand %p965_p9, %p962_p8 }
  0x6b   :  { %970 = shalt.err (!%p967_p10)
}
  0x6c   :  { %s971_s4 = scalar_lea.vmem %s88_s18, 1024  ;;  %p976_p12 = scmp.lt.s32.totalorder %s88_s18, %s88_s18 }
  0x6d   :  { %p972_p11 = scmp.ne.s32.totalorder %s88_s18, %s971_s4  ;;  %p977_p13 = scmp.lt.s32.totalorder %s971_s4, %s971_s4 }
  0x6f   :  { %p978_p0 = por %p977_p13, %p976_p12 }
  0x71   :  { %p979_p1 = pnand %p978_p0, %p972_p11 }
  0x73   :  { %982 = shalt.err (!%p979_p1)
}
  0x74   :  { %93 = dma.hbm_to_vmem [thread:$0]  %s1344_s6, 1024, %s88_s18, [#allocation13], %s1042_s10, %s1042_s10, %s1043_s11  }
  0x75   :  { %s983_s30 = scalar_lea.hbm %s1346_s8, 16 }
  0x76   :  { %p984_p2 = scmp.ne.s32.totalorder %s1346_s8, %s983_s30  ;;  %p987_p3 = scmp.lt.u32.totalorder %s983_s30, %s1346_s8 }
  0x78   :  { %p989_p4 = pnand %p987_p3, %p984_p2 }
  0x7a   :  { %992 = shalt.err (!%p989_p4)
}
  0x7b   :  { %s993_s13 = scalar_lea.vmem %s113_s21, 16  ;;  %s997_s23 = scalar_lea.vmem %s113_s21, 32 }
  0x7c   :  { %p994_p5 = scmp.ne.s32.totalorder %s113_s21, %s993_s13  ;;  %p998_p6 = scmp.lt.s32.totalorder %s113_s21, %s113_s21 }
  0x7d   :  { %p999_p7 = scmp.lt.s32.totalorder %s997_s23, %s993_s13 }
  0x7f   :  { %p1000_p8 = por %p999_p7, %p998_p6 }
  0x81   :  { %p1001_p9 = pnand %p1000_p8, %p994_p5 }
  0x83   :  { %1004 = shalt.err (!%p1001_p9)
}
  0x84   :  { %115 = dma.hbm_to_vmem [thread:$0]  %s1346_s8, 16, %s113_s21, [#allocation16]  }
  0x85   :  { %1027 = dma.done.wait [#allocation7], 128  }
  0x86   :  { %1028 = vsyncadd [#allocation7], 4294967168 }
  0x87   :  { %1029 = dma.done.wait [#allocation10], 2304  }
  0x88   :  { %1030 = vsyncadd [#allocation10], 4294964992 }
  0x89   :  { %1031 = dma.done.wait [#allocation13], 1280  }
  0x8a   :  { %1032 = vsyncadd [#allocation13], 4294966016 }
  0x8b   :  { %1033 = dma.done.wait [#allocation16], 1040  }
  0x8c   :  { %1034 = vsyncadd [#allocation16], 4294966256  ;;  %v1048_v0 = vmov 0.0   ;;  %p697_p10 = scmp.le.s32.totalorder %s1338_s0, 0 }
  0x8d   :  { %151 = vst [vmem:[#allocation2] sm:$0xff] %v1048_v0  ;;  %152 = vst [vmem:[#allocation2 + $0x8] sm:$0xff] %v1048_v0  ;;  %v160_v1 = vld [vmem:[#allocation9 + $0x10] sm:$0xff] (!%p697_p10)  ;;  %v158_v2 = vld [vmem:[#allocation9] sm:$0xff] (!%p697_p10)  ;;  %v1049_v5 = vmov (!%p697_p10), 0.0   ;;  %vm1050_vm0 = vmmov (!%p697_p10), 0  }
  0x8e   :  { %157 = sbr.rel (%p697_p10) target bundleno = 547 (0x223), region = 65  ;;  %178 = vadd.xlane.f32.xlu1 (!%p697_p10), %v160_v1  ;;  %174 = vadd.xlane.f32.xlu0 (!%p697_p10), %v158_v2  ;;  %v161_v3 = vld [vmem:[#allocation9 + $0x18] sm:$0xff] (!%p697_p10)  ;;  %v159_v4 = vld [vmem:[#allocation9 + $0x8] sm:$0xff] (!%p697_p10)  ;;  %v162_v7 = vld [vmem:[#allocation9 + $0x20] sm:$0xff] (!%p697_p10) }
  0x8f   :  { %751 = vmatprep.subr.bf16.mxu0 (!%p697_p10), %v1049_v5  ;;  %v163_v6 = vld [vmem:[#allocation9 + $0x28] sm:$0xff] (!%p697_p10)  ;;  %v1222_v8 = vld [vmem:[#allocation9 + $0x38] sm:$0xff] (!%p697_p10)  ;;  %v1224_v9 = vld [vmem:[#allocation9 + $0x30] sm:$0xff] (!%p697_p10)  ;;  %767 = vmatprep.mubr.msk.bf16.mxu0 (!%p697_p10), %vm1050_vm0, %v1049_v5 }
  0x90   :  { %v1228_v10 = vld [vmem:[#allocation9 + $0x48] sm:$0xff] (!%p697_p10)  ;;  %v1230_v11 = vld [vmem:[#allocation9 + $0x40] sm:$0xff] (!%p697_p10)  ;;  %v1234_v12 = vld [vmem:[#allocation9 + $0x58] sm:$0xff] (!%p697_p10) }
  0x91   :  { %v1236_v13 = vld [vmem:[#allocation9 + $0x50] sm:$0xff] (!%p697_p10)  ;;  %v1240_v14 = vld [vmem:[#allocation9 + $0x68] sm:$0xff] (!%p697_p10)  ;;  %v1242_v15 = vld [vmem:[#allocation9 + $0x60] sm:$0xff] (!%p697_p10) }
  0x92   :  { %180 = vadd.xlane.f32.xlu1 (!%p697_p10), %v161_v3  ;;  %176 = vadd.xlane.f32.xlu0 (!%p697_p10), %v159_v4  ;;  %v1246_v16 = vld [vmem:[#allocation9 + $0x78] sm:$0xff] (!%p697_p10)  ;;  %v1248_v17 = vld [vmem:[#allocation9 + $0x70] sm:$0xff] (!%p697_p10) }
  0x96   :  { %184 = vadd.xlane.f32.xlu1 %v163_v6  ;;  %182 = vadd.xlane.f32.xlu0 %v162_v7 }
  0x9a   :  { %188 = vadd.xlane.f32.xlu1 %v1222_v8  ;;  %186 = vadd.xlane.f32.xlu0 %v1224_v9 }
  0x9e   :  { %192 = vadd.xlane.f32.xlu1 %v1228_v10  ;;  %190 = vadd.xlane.f32.xlu0 %v1230_v11 }
  0xa2   :  { %196 = vadd.xlane.f32.xlu1 %v1234_v12  ;;  %194 = vadd.xlane.f32.xlu0 %v1236_v13 }
  0xa6   :  { %200 = vadd.xlane.f32.xlu1 %v1240_v14  ;;  %198 = vadd.xlane.f32.xlu0 %v1242_v15 }
  0xaa   :  { %204 = vadd.xlane.f32.xlu1 %v1246_v16  ;;  %202 = vadd.xlane.f32.xlu0 %v1248_v17 }
 0x11b   :  { %v179_v18 = vpop.xlane.xlu1 %178  ;;  %v175_v19 = vpop.xlane.xlu0 %174 }
 0x11c   :  { %v208_v20 = vmul.f32 0.0625, %v179_v18  ;;  %v206_v21 = vmul.f32 0.0625, %v175_v19 }
 0x11e   :  { %v222_v22 = vsub.f32 %v158_v2, %v206_v21  ;;  %v224_v23 = vsub.f32 %v160_v1, %v208_v20 }
 0x11f   :  { %v181_v24 = vpop.xlane.xlu1 %180  ;;  %v177_v25 = vpop.xlane.xlu0 %176 }
 0x120   :  { %v209_v26 = vmul.f32 0.0625, %v181_v24  ;;  %v207_v27 = vmul.f32 0.0625, %v177_v25  ;;  %vm254_vm1 = vcmp.lt.f32.partialorder %v222_v22, 0.0  ;;  %vm256_vm2 = vcmp.lt.f32.partialorder %v224_v23, 0.0 }
 0x121   :  { %vm238_vm3 = vcmp.gt.f32.partialorder %v222_v22, 0.0  ;;  %v270_v34 = vsel %vm254_vm1, -1.0, %v1049_v5  ;;  %vm240_vm5 = vcmp.gt.f32.partialorder %v224_v23, 0.0  ;;  %v272_v35 = vsel %vm256_vm2, -1.0, %v1049_v5 }
 0x122   :  { %v225_v28 = vsub.f32 %v161_v3, %v209_v26  ;;  %v223_v29 = vsub.f32 %v159_v4, %v207_v27  ;;  %v286_v40 = vsel %vm238_vm3, 1.0, %v270_v34  ;;  %v288_v49 = vsel %vm240_vm5, 1.0, %v272_v35 }
 0x123   :  { %v185_v30 = vpop.xlane.xlu1 %184  ;;  %v183_v31 = vpop.xlane.xlu0 %182 }
 0x124   :  { %vm257_vm4 = vcmp.lt.f32.partialorder %v225_v28, 0.0  ;;  %v211_v32 = vmul.f32 0.0625, %v185_v30  ;;  %v210_v33 = vmul.f32 0.0625, %v183_v31  ;;  %vm239_vm6 = vcmp.gt.f32.partialorder %v223_v29, 0.0 }
 0x125   :  { %vm255_vm7 = vcmp.lt.f32.partialorder %v223_v29, 0.0  ;;  %vm241_vm8 = vcmp.gt.f32.partialorder %v225_v28, 0.0  ;;  %v273_v39 = vsel %vm257_vm4, -1.0, %v1049_v5 }
 0x126   :  { %v227_v36 = vsub.f32 %v163_v6, %v211_v32  ;;  %v226_v37 = vsub.f32 %v162_v7, %v210_v33  ;;  %v271_v38 = vsel %vm255_vm7, -1.0, %v1049_v5  ;;  %v289_v50 = vsel %vm241_vm8, 1.0, %v273_v39 }
 0x127   :  { %v287_v41 = vsel %vm239_vm6, 1.0, %v271_v38  ;;  %v189_v42 = vpop.xlane.xlu1 %188  ;;  %v187_v43 = vpop.xlane.xlu0 %186  ;;  %v303_v59 = vpack.c.bf16 %v289_v50, %v288_v49 }
 0x128   :  { %vm243_vm9 = vcmp.gt.f32.partialorder %v227_v36, 0.0  ;;  %vm259_vm10 = vcmp.lt.f32.partialorder %v227_v36, 0.0  ;;  %vm242_vm11 = vcmp.gt.f32.partialorder %v226_v37, 0.0  ;;  %vm258_vm12 = vcmp.lt.f32.partialorder %v226_v37, 0.0 }
 0x129   :  { %v275_v44 = vsel %vm259_vm10, -1.0, %v1049_v5  ;;  %v274_v45 = vsel %vm258_vm12, -1.0, %v1049_v5  ;;  %v302_v46 = vpack.c.bf16 %v287_v41, %v286_v40  ;;  %v213_v47 = vmul.f32 0.0625, %v189_v42 }
 0x12a   :  { %v212_v48 = vmul.f32 0.0625, %v187_v43  ;;  %v290_v54 = vsel %vm242_vm11, 1.0, %v274_v45  ;;  %v291_v58 = vsel %vm243_vm9, 1.0, %v275_v44  ;;  %v828_v44 = vld [vmem:[#allocation6] sm:$0xff]   ;;  %v310_v45 = vld [vmem:[#allocation2] sm:$0xff] }
 0x12b   :  { %752 = vmatpush3.bf16.msra.mxu0 %v302_v46  ;;  %v229_v51 = vsub.f32 %v1222_v8, %v213_v47  ;;  %v193_v52 = vpop.xlane.xlu1 %192  ;;  %v191_v53 = vpop.xlane.xlu0 %190  ;;  %v304_v1 = vpack.c.bf16 %v291_v58, %v290_v54  ;;  %v311_v47 = vld [vmem:[#allocation2 + $0x8] sm:$0xff] }
 0x12c   :  { %v228_v55 = vsub.f32 %v1224_v9, %v212_v48  ;;  %753 = vmatprep.subr.bf16.mxu0 %v1049_v5  ;;  %v215_v56 = vmul.f32 0.0625, %v193_v52  ;;  %v214_v57 = vmul.f32 0.0625, %v191_v53 }
 0x12d   :  { %vm245_vm13 = vcmp.gt.f32.partialorder %v229_v51, 0.0  ;;  %vm261_vm14 = vcmp.lt.f32.partialorder %v229_v51, 0.0 }
 0x12e   :  { %v277_v60 = vsel %vm261_vm14, -1.0, %v1049_v5  ;;  %vm244_vm15 = vcmp.gt.f32.partialorder %v228_v55, 0.0  ;;  %vm260_vm0 = vcmp.lt.f32.partialorder %v228_v55, 0.0  ;;  %v231_v61 = vsub.f32 %v1228_v10, %v215_v56 }
 0x12f   :  { %v276_v62 = vsel %vm260_vm0, -1.0, %v1049_v5  ;;  %754 = vmatpush3.bf16.msra.mxu0 %v303_v59  ;;  %v230_v63 = vsub.f32 %v1230_v11, %v214_v57  ;;  %v197_v2 = vpop.xlane.xlu1 %196  ;;  %v195_v3 = vpop.xlane.xlu0 %194  ;;  %v293_v4 = vsel %vm245_vm13, 1.0, %v277_v60 }
 0x130   :  { %vm247_vm1 = vcmp.gt.f32.partialorder %v231_v61, 0.0  ;;  %vm263_vm2 = vcmp.lt.f32.partialorder %v231_v61, 0.0  ;;  %755 = vmatprep.subr.bf16.mxu0 %v1049_v5  ;;  %v217_v6 = vmul.f32 0.0625, %v197_v2  ;;  %v216_v7 = vmul.f32 0.0625, %v195_v3 }
 0x131   :  { %v279_v8 = vsel %vm263_vm2, -1.0, %v1049_v5  ;;  %vm246_vm3 = vcmp.gt.f32.partialorder %v230_v63, 0.0  ;;  %vm262_vm4 = vcmp.lt.f32.partialorder %v230_v63, 0.0  ;;  %v292_v9 = vsel %vm244_vm15, 1.0, %v276_v62 }
 0x132   :  { %v278_v10 = vsel %vm262_vm4, -1.0, %v1049_v5  ;;  %v233_v11 = vsub.f32 %v1234_v12, %v217_v6  ;;  %v232_v18 = vsub.f32 %v1236_v13, %v216_v7  ;;  %v305_v19 = vpack.c.bf16 %v293_v4, %v292_v9 }
 0x133   :  { %756 = vmatpush3.bf16.msra.mxu0 %v304_v1  ;;  %v201_v20 = vpop.xlane.xlu1 %200  ;;  %v199_v21 = vpop.xlane.xlu0 %198  ;;  %v294_v22 = vsel %vm246_vm3, 1.0, %v278_v10  ;;  %v295_v23 = vsel %vm247_vm1, 1.0, %v279_v8 }
 0x134   :  { %vm249_vm5 = vcmp.gt.f32.partialorder %v233_v11, 0.0  ;;  %vm265_vm6 = vcmp.lt.f32.partialorder %v233_v11, 0.0  ;;  %vm248_vm7 = vcmp.gt.f32.partialorder %v232_v18, 0.0  ;;  %vm264_vm8 = vcmp.lt.f32.partialorder %v232_v18, 0.0  ;;  %757 = vmatprep.subr.bf16.mxu0 %v1049_v5 }
 0x135   :  { %v281_v24 = vsel %vm265_vm6, -1.0, %v1049_v5  ;;  %v280_v25 = vsel %vm264_vm8, -1.0, %v1049_v5  ;;  %v219_v12 = vmul.f32 0.0625, %v201_v20  ;;  %v218_v26 = vmul.f32 0.0625, %v199_v21 }
 0x136   :  { %v306_v28 = vpack.c.bf16 %v295_v23, %v294_v22  ;;  %v296_v33 = vsel %vm248_vm7, 1.0, %v280_v25  ;;  %v297_v34 = vsel %vm249_vm5, 1.0, %v281_v24 }
 0x137   :  { %758 = vmatpush3.bf16.msra.mxu0 %v305_v19  ;;  %v235_v13 = vsub.f32 %v1240_v14, %v219_v12  ;;  %v234_v27 = vsub.f32 %v1242_v15, %v218_v26  ;;  %v205_v29 = vpop.xlane.xlu1 %204  ;;  %v203_v30 = vpop.xlane.xlu0 %202  ;;  %v307_v37 = vpack.c.bf16 %v297_v34, %v296_v33 }
 0x138   :  { %759 = vmatprep.subr.bf16.mxu0 %v1049_v5  ;;  %v221_v31 = vmul.f32 0.0625, %v205_v29  ;;  %v220_v32 = vmul.f32 0.0625, %v203_v30 }
 0x139   :  { %vm251_vm9 = vcmp.gt.f32.partialorder %v235_v13, 0.0  ;;  %vm267_vm10 = vcmp.lt.f32.partialorder %v235_v13, 0.0  ;;  %vm250_vm11 = vcmp.gt.f32.partialorder %v234_v27, 0.0  ;;  %vm266_vm12 = vcmp.lt.f32.partialorder %v234_v27, 0.0 }
 0x13a   :  { %v283_v35 = vsel %vm267_vm10, -1.0, %v1049_v5  ;;  %v282_v14 = vsel %vm266_vm12, -1.0, %v1049_v5  ;;  %v237_v15 = vsub.f32 %v1246_v16, %v221_v31  ;;  %v236_v36 = vsub.f32 %v1248_v17, %v220_v32 }
 0x13b   :  { %760 = vmatpush3.bf16.msra.mxu0 %v306_v28  ;;  %v298_v38 = vsel %vm250_vm11, 1.0, %v282_v14  ;;  %v299_v39 = vsel %vm251_vm9, 1.0, %v283_v35 }
 0x13c   :  { %vm269_vm13 = vcmp.lt.f32.partialorder %v237_v15, 0.0  ;;  %vm268_vm14 = vcmp.lt.f32.partialorder %v236_v36, 0.0  ;;  %761 = vmatprep.subr.bf16.mxu0 %v1049_v5  ;;  %vm253_vm15 = vcmp.gt.f32.partialorder %v237_v15, 0.0  ;;  %vm252_vm0 = vcmp.gt.f32.partialorder %v236_v36, 0.0 }
 0x13d   :  { %v285_v40 = vsel %vm269_vm13, -1.0, %v1049_v5  ;;  %v284_v41 = vsel %vm268_vm14, -1.0, %v1049_v5  ;;  %v308_v42 = vpack.c.bf16 %v299_v39, %v298_v38 }
 0x13e   :  { %v301_v43 = vsel %vm253_vm15, 1.0, %v285_v40  ;;  %v300_v16 = vsel %vm252_vm0, 1.0, %v284_v41 }
 0x13f   :  { %762 = vmatpush3.bf16.msra.mxu0 %v307_v37  ;;  %v309_v17 = vpack.c.bf16 %v301_v43, %v300_v16 }
 0x140   :  { %763 = vmatprep.subr.bf16.mxu0 %v1049_v5 }
 0x143   :  { %764 = vmatpush3.bf16.msra.mxu0 %v308_v42 }
 0x144   :  { %765 = vmatprep.subr.bf16.mxu0 %v1049_v5 }
 0x147   :  { %766 = vmatpush3.bf16.msra.mxu0 %v309_v17 }
 0x14a   :  { %768 = vmatmul.mubr.bf16.vlgmr.msra.gmra.mrb[0].mxu0 %v828_v44 }
 0x21d   :  { %v354_v46 = vpop.f32.mrb[0].mxu0 }
 0x21e   :  { %v361_v48 = vadd.f32 %v354_v46, %v310_v45  ;;  %v769_v49 = vpop.f32.mrb[1].mxu0 }
 0x21f   :  { %v357_v50 = vpop.f32.mrb[2].mxu0 }
 0x220   :  { %363 = vst [vmem:[#allocation2] sm:$0xff] %v361_v48  ;;  %v362_v51 = vadd.f32 %v357_v50, %v311_v47  ;;  %v770_v52 = vpop.f32.mrb[3].mxu0 }
 0x222   :  { %364 = vst [vmem:[#allocation2 + $0x8] sm:$0xff] %v362_v51 }
 0x223 PF:  { %v1293_v53 = vld [vmem:[#allocation11] sm:$0xff]  ;;  %v1295_v54 = vld [vmem:[#allocation11 + $0x8] sm:$0xff]  ;;  %771 = vmatprep.subr.bf16.mxu0 %v1048_v0  ;;  %791 = vmatprep.subr.bf16.mxu1 %v1048_v0  ;;  %v834_v58 = vld [vmem:[#allocation14 + $0x10] sm:$0xff]   ;;  %vm1051_vm1 = vmmov 0   ;;  %v1052_v11 = vmov 0   ;;  %v627_v44 = vlaneseq  ;;  %s1053_s0 = smov [#allocation18]  }
 0x224   :  { %370 = vadd.xlane.f32.xlu0 %v1293_v53  ;;  %v831_v5 = vld [vmem:[#allocation14] sm:$0xff]   ;;  %v832_v55 = vld [vmem:[#allocation14 + $0x8] sm:$0xff]   ;;  %v837_v59 = vld [vmem:[#allocation15 + $0x10] sm:$0xff]   ;;  %787 = vmatprep.mubr.msk.bf16.mxu0 %vm1051_vm1, %v1048_v0  ;;  %s674_s8 = sshll.u32 %s1053_s0, 4  ;;  %s675_s8 = int_to_ptr.vmem [resolvable:$true] %s674_s8 }
 0x225   :  { %772 = vmatpush3.bf16.msra.mxu0 %v831_v5  ;;  %v833_v56 = vld [vmem:[#allocation15] sm:$0xff]   ;;  %v835_v57 = vld [vmem:[#allocation15 + $0x8] sm:$0xff]   ;;  %v836_v60 = vld [vmem:[#allocation14 + $0x18] sm:$0xff]   ;;  %807 = vmatprep.mubr.msk.bf16.mxu1 %vm1051_vm1, %v1048_v0  ;;  %v628_v50 = vand.u32 127, %v627_v44  ;;  %s1005_s18 = scalar_lea.vmem %s675_s8, 128  ;;  %p1010_p12 = scmp.lt.s32.totalorder %s675_s8, %s675_s8 }
 0x226   :  { %773 = vmatprep.subr.bf16.mxu0 %v1048_v0  ;;  %792 = vmatpush3.bf16.msra.mxu1 %v833_v56  ;;  %v839_v61 = vld [vmem:[#allocation15 + $0x18] sm:$0xff]   ;;  %v838_v62 = vld [vmem:[#allocation14 + $0x20] sm:$0xff]   ;;  %v840_v1 = vld [vmem:[#allocation14 + $0x28] sm:$0xff]   ;;  %p1006_p11 = scmp.ne.s32.totalorder %s675_s8, %s1005_s18  ;;  %p1011_p13 = scmp.lt.s32.totalorder %s1005_s18, %s1005_s18 }
 0x227   :  { %793 = vmatprep.subr.bf16.mxu1 %v1048_v0  ;;  %v841_v63 = vld [vmem:[#allocation15 + $0x20] sm:$0xff]   ;;  %v843_v2 = vld [vmem:[#allocation15 + $0x28] sm:$0xff]   ;;  %v842_v3 = vld [vmem:[#allocation14 + $0x30] sm:$0xff]   ;;  %829 = vset.pattern.permute.xlu1 %v1052_v11  ;;  %vm629_vm10 = vcmp.lt.s32.totalorder %v628_v50, 32 }
 0x228   :  { %372 = vadd.xlane.f32.xlu0 %v1295_v54  ;;  %v845_v4 = vld [vmem:[#allocation15 + $0x30] sm:$0xff]   ;;  %v844_v6 = vld [vmem:[#allocation14 + $0x38] sm:$0xff]   ;;  %v389_v7 = vld [vmem:[#allocation2] sm:$0xff]  ;;  %p1012_p0 = por %p1011_p13, %p1010_p12 }
 0x229   :  { %774 = vmatpush3.bf16.msra.mxu0 %v832_v55  ;;  %v390_v8 = vld [vmem:[#allocation2 + $0x8] sm:$0xff]  ;;  %v846_v10 = vld [vmem:[#allocation15 + $0x38] sm:$0xff]   ;;  %830 = vset.pattern.permute.xlu0 %v1052_v11  ;;  %v715_v15 = vld [vmem:[#allocation17] ss:$0 sm:$0xff] }
 0x22a   :  { %775 = vmatprep.subr.bf16.mxu0 %v1048_v0  ;;  %794 = vmatpush3.bf16.msra.mxu1 %v835_v57  ;;  %v387_v9 = vld [vmem:[#allocation12] sm:$0xff]  ;;  %v391_v18 = vpack.c.bf16 %v390_v8, %v389_v7  ;;  %v388_v19 = vld [vmem:[#allocation12 + $0x8] sm:$0xff]  ;;  %p1013_p1 = pnand %p1012_p0, %p1006_p11 }
 0x22b   :  { %795 = vmatprep.subr.bf16.mxu1 %v1048_v0  ;;  %499 = vperm.xlu1 %829, %v387_v9  }
 0x22d   :  { %776 = vmatpush3.bf16.msra.mxu0 %v834_v58 }
 0x22e   :  { %777 = vmatprep.subr.bf16.mxu0 %v1048_v0  ;;  %796 = vmatpush3.bf16.msra.mxu1 %v837_v59 }
 0x22f   :  { %797 = vmatprep.subr.bf16.mxu1 %v1048_v0  ;;  %504 = vperm.xlu1 %829, %v388_v19  }
 0x231   :  { %778 = vmatpush3.bf16.msra.mxu0 %v836_v60 }
 0x232   :  { %779 = vmatprep.subr.bf16.mxu0 %v1048_v0  ;;  %798 = vmatpush3.bf16.msra.mxu1 %v839_v61 }
 0x233   :  { %799 = vmatprep.subr.bf16.mxu1 %v1048_v0 }
 0x235   :  { %780 = vmatpush3.bf16.msra.mxu0 %v838_v62 }
 0x236   :  { %781 = vmatprep.subr.bf16.mxu0 %v1048_v0  ;;  %800 = vmatpush3.bf16.msra.mxu1 %v841_v63 }
 0x237   :  { %801 = vmatprep.subr.bf16.mxu1 %v1048_v0 }
 0x239   :  { %782 = vmatpush3.bf16.msra.mxu0 %v840_v1 }
 0x23a   :  { %783 = vmatprep.subr.bf16.mxu0 %v1048_v0  ;;  %802 = vmatpush3.bf16.msra.mxu1 %v843_v2 }
 0x23b   :  { %803 = vmatprep.subr.bf16.mxu1 %v1048_v0 }
 0x23d   :  { %784 = vmatpush3.bf16.msra.mxu0 %v842_v3 }
 0x23e   :  { %785 = vmatprep.subr.bf16.mxu0 %v1048_v0  ;;  %804 = vmatpush3.bf16.msra.mxu1 %v845_v4 }
 0x23f   :  { %805 = vmatprep.subr.bf16.mxu1 %v1048_v0 }
 0x241   :  { %786 = vmatpush3.bf16.msra.mxu0 %v844_v6 }
 0x242   :  { %806 = vmatpush3.bf16.msra.mxu1 %v846_v10 }
 0x244   :  { %788 = vmatmul.mubr.bf16.vlgmr.msra.gmra.mrb[0].mxu0 %v391_v18 }
 0x2aa   :  { %v500_v33 = vpop.permute.xlu1 %499 }
 0x2ae   :  { %v505_v34 = vpop.permute.xlu1 %504 }
 0x2b1   :  { %v371_v20 = vpop.xlane.xlu0 %370 }
 0x2b2   :  { %v374_v21 = vmul.f32 0.0625, %v371_v20 }
 0x2b4   :  { %v376_v22 = vsub.f32 %v1293_v53, %v374_v21 }
 0x2b5   :  { %v373_v23 = vpop.xlane.xlu0 %372 }
 0x2b6   :  { %vm380_vm2 = vcmp.lt.f32.partialorder %v376_v22, 0.0  ;;  %v375_v24 = vmul.f32 0.0625, %v373_v23  ;;  %vm378_vm3 = vcmp.gt.f32.partialorder %v376_v22, 0.0 }
 0x2b7   :  { %v382_v12 = vsel %vm380_vm2, -1.0, %v1048_v0 }
 0x2b8   :  { %v377_v25 = vsub.f32 %v1295_v54, %v375_v24  ;;  %v384_v13 = vsel %vm378_vm3, 1.0, %v382_v12 }
 0x2ba   :  { %vm379_vm4 = vcmp.gt.f32.partialorder %v377_v25, 0.0  ;;  %vm381_vm5 = vcmp.lt.f32.partialorder %v377_v25, 0.0 }
 0x2bb   :  { %v383_v26 = vsel %vm381_vm5, -1.0, %v1048_v0 }
 0x2bc   :  { %v385_v27 = vsel %vm379_vm4, 1.0, %v383_v26 }
 0x2bd   :  { %v386_v28 = vpack.c.bf16 %v385_v27, %v384_v13 }
 0x2bf   :  { %808 = vmatmul.mubr.bf16.vlgmr.msra.gmra.mrb[0].mxu1 %v386_v28 }
 0x317   :  { %v490_v29 = vpop.f32.mrb[0].mxu0 }
 0x318   :  { %v789_v30 = vpop.f32.mrb[1].mxu0  ;;  %v507_v35 = vmul.f32 %v500_v33, %v490_v29 }
 0x319   :  { %v493_v31 = vpop.f32.mrb[2].mxu0 }
 0x31a   :  { %v790_v32 = vpop.f32.mrb[3].mxu0  ;;  %v508_v36 = vmul.f32 %v505_v34, %v493_v31 }
 0x392   :  { %v607_v14 = vpop.f32.mrb[0].mxu1 }
 0x393   :  { %v614_v37 = vadd.f32 %v607_v14, %v507_v35  ;;  %v809_v38 = vpop.f32.mrb[1].mxu1 }
 0x394   :  { %v610_v39 = vpop.f32.mrb[2].mxu1 }
 0x395   :  { %v615_v40 = vadd.f32 %v610_v39, %v508_v36  ;;  %v810_v41 = vpop.f32.mrb[3].mxu1  ;;  %v623_v42 = vadd.f32 %v715_v15, %v614_v37 }
 0x397   :  { %v625_v43 = vmax.f32 %v623_v42, 0.0  ;;  %v624_v16 = vadd.f32 %v715_v15, %v615_v40 }
 0x399   :  { %630 = vadd.xlane.f32.xlu0 %v625_v43  ;;  %v626_v17 = vmax.f32 %v624_v16, 0.0 }
 0x39b   :  { %632 = vadd.xlane.f32.xlu1 %v626_v17 }
 0x426   :  { %v631_v45 = vpop.xlane.xlu0 %630 }
 0x427   :  { %v634_v46 = vmul.f32 0.03125, %v631_v45 }
 0x428   :  { %v633_v47 = vpop.xlane.xlu1 %632 }
 0x429   :  { %v636_v48 = vsub.f32 %v625_v43, %v634_v46  ;;  %v635_v49 = vmul.f32 0.03125, %v633_v47 }
 0x42b   :  { %vm638_vm6 = vcmp.gt.f32.partialorder %v636_v48, 0.0  ;;  %vm640_vm7 = vcmp.lt.f32.partialorder %v636_v48, 0.0  ;;  %v637_v51 = vsub.f32 %v626_v17, %v635_v49 }
 0x42c   :  { %v642_v52 = vsel %vm640_vm7, -1.0, %v1048_v0 }
 0x42d   :  { %vm639_vm8 = vcmp.gt.f32.partialorder %v637_v51, 0.0  ;;  %vm641_vm9 = vcmp.lt.f32.partialorder %v637_v51, 0.0  ;;  %v644_v53 = vsel %vm638_vm6, 1.0, %v642_v52 }
 0x42e   :  { %v643_v54 = vsel %vm641_vm9, -1.0, %v1048_v0  ;;  %v646_v55 = vsel %vm629_vm10, %v644_v53, 0.0 }
 0x42f   :  { %v645_v5 = vsel %vm639_vm8, 1.0, %v643_v54 }
 0x430   :  { %v647_v56 = vsel %vm629_vm10, %v645_v5, 0.0 }
 0x431   :  { %v722_v57 = vpack.c.bf16 %v647_v56, %v646_v55 }
 0x433   :  { %723 = vst [vmem:[#allocation18] sm:$0xff] %v722_v57  }
 0x434   :  { %1016 = shalt.err (!%p1013_p1)
}
 0x435   :  { %s1017_s22 = scalar_lea.hbm %s1347_s9, 128 }
 0x436   :  { %p1018_p2 = scmp.ne.s32.totalorder %s1347_s9, %s1017_s22  ;;  %p1021_p3 = scmp.lt.u32.totalorder %s1017_s22, %s1347_s9 }
 0x438   :  { %p1023_p4 = pnand %p1021_p3, %p1018_p2 }
 0x43a   :  { %1026 = shalt.err (!%p1023_p4)
}
 0x43b   :  { %680 = dma.vmem_to_hbm [thread:$0]  %s675_s8, 128, %s1347_s9, [#allocation8], %s1042_s10, %s1042_s10, %s1043_s11  }
 0x43c   :  { %1035 = dma.done.wait [#allocation8], 128  }
 0x43d   :  { %1036 = vsyncadd [#allocation8], 4294967168 }
 0x43e   :  { %684 = vsyncpa [#allocation7], 1 }
 0x43f   :  { %685 = vsyncpa [#allocation10], 1 }
 0x440   :  { %686 = vsyncpa [#allocation13], 1 }
 0x441   :  { %687 = vsyncpa [#allocation16], 1 }
 0x442   :  { %688 = vsyncpa [#allocation8], 1 }

</bundles_post_ra>
